<compile_context>
chip_gen: v5e
topology: v5e:2x2
jax: 0.10.0
libtpu: 0.0.40
codegen_flags: <defaults>
</compile_context>

<pallas_src>
import functools

import jax
import jax.numpy as jnp
from jax.experimental import pallas as pl
from jax.experimental.pallas import tpu as pltpu


def _round_up(x, m):
    return ((x + m - 1) // m) * m


def _vmem_capacity_bytes():
    """Per-core VMEM capacity; conservative v7x fallback if the query fails."""
    try:
        return int(pltpu.get_tpu_info().vmem_capacity_bytes)
    except Exception:
        return 64 * 2 ** 20


def _layer_vmem_bytes(tm, tk, f_pad, h_pad, a_bytes, x_bytes, out_bytes):
    """Estimated resident VMEM footprint of one layer's pipeline."""
    return (2 * tm * tk * a_bytes              # A tiles (double-buffered)
            + 2 * tk * f_pad * x_bytes         # X tiles feeding A@X
            + 2 * tm * f_pad * x_bytes         # X self-row tiles
            + 2 * 2 * f_pad * h_pad * x_bytes  # W_self + W_neigh (const index)
            + 2 * h_pad * 4                    # bias
            + 2 * tm * 4                       # 1/deg column
            + 2 * tm * h_pad * out_bytes       # output tiles
            + tm * f_pad * 4)                  # f32 accumulator scratch


_TILE_CANDIDATES = [(512, 1024), (512, 512), (256, 512), (256, 256),
                    (128, 256), (128, 128), (64, 128), (32, 128),
                    (16, 128), (8, 128)]


def _pick_tiles(n, f_max_pad, h_pad, a_bytes, x_bytes, vmem_cap):
    """Row tile TM, reduction tile TK, padded node count (divisible by both)."""
    budget = int(0.75 * vmem_cap)
    n128 = _round_up(n, 128)
    fits = []
    for tm, tk in _TILE_CANDIDATES:          # tm always divides tk
        if tk > n128:                        # don't tile wider than the graph
            continue
        est = _layer_vmem_bytes(tm, tk, f_max_pad, h_pad, a_bytes, x_bytes, 4)
        if est > budget:
            continue
        fits.append((tm, tk, _round_up(n, tk)))
    if not fits:
        fits = [(8, 128, _round_up(n, 128))]
    # Prefer >=2 (and even) row blocks so the "parallel" row axis splits evenly
    # across v7x's two TensorCores; otherwise take the largest fitting tile.
    for tm, tk, n_pad in fits:
        nm = n_pad // tm
        if nm >= 2 and nm % 2 == 0:
            return tm, tk, n_pad
    return fits[0]


def _pad_layer(w_self, w_neigh, b, f_pad, h_pad, dtype):
    f_in, h_out = w_self.shape
    ws = jnp.zeros((f_pad, h_pad), dtype).at[:f_in, :h_out].set(w_self.astype(dtype))
    wn = jnp.zeros((f_pad, h_pad), dtype).at[:f_in, :h_out].set(w_neigh.astype(dtype))
    bp = jnp.zeros((1, h_pad), jnp.float32).at[:, :h_out].set(
        jnp.asarray(b, jnp.float32).reshape(1, h_out))
    return ws, wn, bp


def _sage_layer_kernel(cid_ref, cnt_ref, a_ref, xk_ref, xs_ref, ws_ref, wn_ref,
                       b_ref, dinv_ref, out_ref, acc_ref, *, apply_relu):
    i = pl.program_id(0)
    k = pl.program_id(1)
    nk = pl.num_programs(1)

    @pl.when(k == 0)
    def _():
        acc_ref[...] = jnp.zeros_like(acc_ref)

    # Only real (nonzero) adjacency blocks contribute; past the per-row count the
    # index_map repeats the last valid block (DMA dedup'd) and compute is skipped.
    @pl.when(k < cnt_ref[i])
    def _():
        acc_ref[...] += jnp.dot(a_ref[...], xk_ref[...],
                                preferred_element_type=jnp.float32)

    @pl.when(k == nk - 1)
    def _():
        neigh = acc_ref[...] * dinv_ref[...]          # mean applied in f32
        # Two MXU dots (no lane-axis concatenate temp).
        h = jnp.dot(xs_ref[...], ws_ref[...], preferred_element_type=jnp.float32)
        h = h + jnp.dot(neigh.astype(wn_ref.dtype), wn_ref[...],
                        preferred_element_type=jnp.float32)
        h = h + b_ref[...]
        if apply_relu:
            h = jnp.maximum(h, 0.0)
        out_ref[...] = h.astype(out_ref.dtype)


def _sage_layer(col_ids, nnz, a_pad, x_pad, w_self, w_neigh, b_pad, deg_inv, *,
                tm, tk, max_nnz, apply_relu, out_dtype, vmem_cap):
    n_pad = a_pad.shape[0]
    f_pad = x_pad.shape[1]
    h_pad = w_self.shape[1]
    nm = n_pad // tm

    a_bytes = jnp.dtype(a_pad.dtype).itemsize
    x_bytes = jnp.dtype(x_pad.dtype).itemsize
    out_bytes = jnp.dtype(out_dtype).itemsize
    est = _layer_vmem_bytes(tm, tk, f_pad, h_pad, a_bytes, x_bytes, out_bytes)
    vmem_limit = int(min(int(0.9 * vmem_cap), max(32 * 2 ** 20, 2 * est)))

    grid_spec = pltpu.PrefetchScalarGridSpec(
        num_scalar_prefetch=2,
        grid=(nm, max_nnz),
        in_specs=[
            # A: only nonzero col blocks of row block i are ever fetched.
            pl.BlockSpec((tm, tk), lambda i, k, cid, cnt: (i, cid[i, k])),
            # X rows feeding the aggregation matmul (follows the same col block).
            pl.BlockSpec((tk, f_pad), lambda i, k, cid, cnt: (cid[i, k], 0)),
            # X self rows.
            pl.BlockSpec((tm, f_pad), lambda i, k, cid, cnt: (i, 0)),
            # W_self / W_neigh / bias (constant block index -> DMA'd once).
            pl.BlockSpec((f_pad, h_pad), lambda i, k, cid, cnt: (0, 0)),
            pl.BlockSpec((f_pad, h_pad), lambda i, k, cid, cnt: (0, 0)),
            pl.BlockSpec((1, h_pad), lambda i, k, cid, cnt: (0, 0)),
            # 1/deg column for the f32 mean scale.
            pl.BlockSpec((tm, 1), lambda i, k, cid, cnt: (i, 0)),
        ],
        out_specs=pl.BlockSpec((tm, h_pad), lambda i, k, cid, cnt: (i, 0)),
        scratch_shapes=[pltpu.VMEM((tm, f_pad), jnp.float32)],
    )
    return pl.pallas_call(
        functools.partial(_sage_layer_kernel, apply_relu=apply_relu),
        out_shape=jax.ShapeDtypeStruct((n_pad, h_pad), out_dtype),
        grid_spec=grid_spec,
        compiler_params=pltpu.CompilerParams(
            dimension_semantics=("parallel", "arbitrary"),
            vmem_limit_bytes=vmem_limit,
        ),
    )(col_ids, nnz, a_pad, x_pad, x_pad, w_self, w_neigh, b_pad, deg_inv)


def graphsage_forward(adj, x, params, *, compute_dtype=jnp.bfloat16):
    """adj: (N, N) adjacency (row i lists i's in-neighbors). x: (N, in_feats)."""
    n, in_feats = x.shape
    h_feats = params["w_self1"].shape[1]

    f_pad = _round_up(in_feats, 128)       # lane-dense input feature dim
    h_pad = _round_up(h_feats, 128)        # lane-dense hidden/output dim

    a_bytes = jnp.dtype(compute_dtype).itemsize
    vmem_cap = _vmem_capacity_bytes()
    tm, tk, n_pad = _pick_tiles(n, max(f_pad, h_pad), h_pad,
                                a_bytes, a_bytes, vmem_cap)

    # Binary adjacency streamed in bf16 (0/1 exact); mean applied in f32 via
    # deg_inv in the epilogue.  Padded directly in bf16 (no f32 N_pad^2 temp).
    a_bin = (adj != 0).astype(compute_dtype)
    a_pad = jnp.pad(a_bin, ((0, n_pad - n), (0, n_pad - n)))

    deg = jnp.clip(jnp.sum(adj != 0, axis=1).astype(jnp.float32), 1.0, None)
    deg_inv = jnp.pad((1.0 / deg)[:, None], ((0, n_pad - n), (0, 0)))

    x_pad = jnp.zeros((n_pad, f_pad), compute_dtype).at[:n, :in_feats].set(
        x.astype(compute_dtype))

    # Block-sparsity metadata: per row-block compacted nonzero col-block indices
    # (+ counts).  The reduction grid axis only covers nonzero blocks, so empty
    # adjacency blocks cost neither DMA nor MXU work.  (Requires a concrete
    # adjacency: the max nonzero-block count fixes the grid extent.)
    nm, nk = n_pad // tm, n_pad // tk
    nz = (a_pad.reshape(nm, tm, nk, tk) != 0).any(axis=(1, 3))          # (nm, nk)
    nnz = nz.sum(axis=1).astype(jnp.int32)                              # (nm,)
    order = jnp.argsort(~nz, axis=1).astype(jnp.int32)                  # nonzero first
    last = order[jnp.arange(nm), jnp.maximum(nnz - 1, 0)]
    col_ids = jnp.where(jnp.arange(nk)[None, :] < nnz[:, None],
                        order, last[:, None])
    max_nnz = max(int(jnp.max(nnz)), 1)
    col_ids = col_ids[:, :max_nnz].astype(jnp.int32)

    ws1, wn1, b1 = _pad_layer(params["w_self1"], params["w_neigh1"], params["b1"],
                              f_pad, h_pad, compute_dtype)
    ws2, wn2, b2 = _pad_layer(params["w_self2"], params["w_neigh2"], params["b2"],
                              h_pad, h_pad, compute_dtype)

    # Layer 1 (+ReLU) -> HBM round-trip (layer 2 needs the complete h) -> layer 2.
    h = _sage_layer(col_ids, nnz, a_pad, x_pad, ws1, wn1, b1, deg_inv,
                    tm=tm, tk=tk, max_nnz=max_nnz, apply_relu=True,
                    out_dtype=compute_dtype, vmem_cap=vmem_cap)
    out = _sage_layer(col_ids, nnz, a_pad, h, ws2, wn2, b2, deg_inv,
                      tm=tm, tk=tk, max_nnz=max_nnz, apply_relu=False,
                      out_dtype=jnp.float32, vmem_cap=vmem_cap)
    return out[:n, :h_feats]


def init_params(key, in_feats, h_feats):
    ks = jax.random.split(key, 4)
    s1 = 1.0 / jnp.sqrt(in_feats)
    s2 = 1.0 / jnp.sqrt(h_feats)
    return {
        "w_self1":  jax.random.uniform(ks[0], (in_feats, h_feats), jnp.float32, -s1, s1),
        "w_neigh1": jax.random.uniform(ks[1], (in_feats, h_feats), jnp.float32, -s1, s1),
        "b1":       jnp.zeros((1, h_feats), jnp.float32),
        "w_self2":  jax.random.uniform(ks[2], (h_feats, h_feats), jnp.float32, -s2, s2),
        "w_neigh2": jax.random.uniform(ks[3], (h_feats, h_feats), jnp.float32, -s2, s2),
        "b2":       jnp.zeros((1, h_feats), jnp.float32),
    }


if __name__ == "__main__":
    key = jax.random.PRNGKey(0)
    k_graph, k_feat, k_param = jax.random.split(key, 3)

    num_nodes = 64
    in_feats = 16
    h_feats = 32

    # Synthetic graph: random sparse directed adjacency (plain-JAX glue).
    adj = (jax.random.uniform(k_graph, (num_nodes, num_nodes)) < 0.1).astype(jnp.float32)
    x = jax.random.normal(k_feat, (num_nodes, in_feats), jnp.float32)
    params = init_params(k_param, in_feats, h_feats)

    out = graphsage_forward(adj, x, params)
    jax.block_until_ready(out)
    assert out.shape == (num_nodes, h_feats)

    # Plain-JAX reference mirroring the kernel's math: binary bf16 adjacency,
    # f32 MXU accumulation, 1/deg applied in f32 to the aggregated sum.
    cd = jnp.bfloat16
    a_bin = (adj != 0).astype(cd)
    deg_inv = (1.0 / jnp.clip(jnp.sum(adj != 0, axis=1).astype(jnp.float32),
                              1.0, None))[:, None]
    x_c = x.astype(cd)
    n1 = jnp.dot(a_bin, x_c, preferred_element_type=jnp.float32) * deg_inv
    h_ref = (jnp.dot(x_c, params["w_self1"].astype(cd), preferred_element_type=jnp.float32)
             + jnp.dot(n1.astype(cd), params["w_neigh1"].astype(cd),
                       preferred_element_type=jnp.float32)
             + params["b1"])
    h_c = jnp.maximum(h_ref, 0.0).astype(cd)
    n2 = jnp.dot(a_bin, h_c, preferred_element_type=jnp.float32) * deg_inv
    ref = (jnp.dot(h_c, params["w_self2"].astype(cd), preferred_element_type=jnp.float32)
           + jnp.dot(n2.astype(cd), params["w_neigh2"].astype(cd),
                     preferred_element_type=jnp.float32)
           + params["b2"])

    assert jnp.allclose(out, ref, atol=3e-2, rtol=3e-2), \
        float(jnp.max(jnp.abs(out - ref)))

    print("KERNEL_OK")
</pallas_src>

<mosaic_0001>
module attributes {stable_mosaic.version = 11 : i64} {
  func.func @_sage_layer_kernel(%arg0: i32, %arg1: i32, %arg2: memref<2x1xi32, #tpu.memory_space<smem>>, %arg3: memref<2xi32, #tpu.memory_space<smem>>, %arg4: memref<64x128xbf16, #tpu.memory_space<vmem>>, %arg5: memref<128x128xbf16, #tpu.memory_space<vmem>>, %arg6: memref<64x128xbf16, #tpu.memory_space<vmem>>, %arg7: memref<128x128xbf16, #tpu.memory_space<vmem>>, %arg8: memref<128x128xbf16, #tpu.memory_space<vmem>>, %arg9: memref<1x128xf32, #tpu.memory_space<vmem>>, %arg10: memref<64x1xf32, #tpu.memory_space<vmem>>, %arg11: memref<64x128xbf16, #tpu.memory_space<vmem>>, %arg12: memref<64x128xf32, #tpu.memory_space<vmem>>) attributes {dimension_semantics = [#tpu.dimension_semantics<parallel>, #tpu.dimension_semantics<arbitrary>], iteration_bounds = array<i64: 2, 1>, scalar_prefetch = 2 : i64, scratch_operands = 1 : i64, tpu.core_type = #tpu.core_type<tc>, window_params = [{transform_indices = @transform_0, window_bounds = array<i64: 64, 128>}, {transform_indices = @transform_1, window_bounds = array<i64: 128, 128>}, {transform_indices = @transform_2, window_bounds = array<i64: 64, 128>}, {pipeline_mode = #tpu.pipeline_mode<synchronous>, transform_indices = @transform_3, window_bounds = array<i64: 128, 128>}, {pipeline_mode = #tpu.pipeline_mode<synchronous>, transform_indices = @transform_4, window_bounds = array<i64: 128, 128>}, {pipeline_mode = #tpu.pipeline_mode<synchronous>, transform_indices = @transform_5, window_bounds = array<i64: 1, 128>}, {transform_indices = @transform_6, window_bounds = array<i64: 64, 1>}, {transform_indices = @transform_7, window_bounds = array<i64: 64, 128>}]} {
    %c0_i32 = arith.constant 0 : i32
    %0 = arith.cmpi eq, %arg1, %c0_i32 : i32
    %1 = arith.extui %0 : i1 to i32
    %c0_i32_0 = arith.constant 0 : i32
    %2 = arith.cmpi ne, %1, %c0_i32_0 : i32
    scf.if %2 {
      %cst = arith.constant 0.000000e+00 : f32
      %11 = vector.broadcast %cst : f32 to vector<64x128xf32>
      %c0 = arith.constant 0 : index
      %c0_4 = arith.constant 0 : index
      %12 = vector.load %arg12[%c0, %c0_4] : memref<64x128xf32, #tpu.memory_space<vmem>>, vector<64x128xf32>
      tpu.vector_store %arg12[%c0, %c0_4], %11 {strides = array<i32>} : memref<64x128xf32, #tpu.memory_space<vmem>>, vector<64x128xf32>,
    } else {
    }
    %3 = arith.index_cast %arg0 : i32 to index
    %4 = memref.load %arg3[%3] : memref<2xi32, #tpu.memory_space<smem>>
    %5 = arith.cmpi slt, %arg1, %4 : i32
    %6 = arith.extui %5 : i1 to i32
    %c0_i32_1 = arith.constant 0 : i32
    %7 = arith.cmpi ne, %6, %c0_i32_1 : i32
    scf.if %7 {
      %c0 = arith.constant 0 : index
      %c0_4 = arith.constant 0 : index
      %11 = vector.load %arg12[%c0, %c0_4] : memref<64x128xf32, #tpu.memory_space<vmem>>, vector<64x128xf32>
      %c0_5 = arith.constant 0 : index
      %c0_6 = arith.constant 0 : index
      %12 = vector.load %arg4[%c0_5, %c0_6] : memref<64x128xbf16, #tpu.memory_space<vmem>>, vector<64x128xbf16>
      %c0_7 = arith.constant 0 : index
      %c0_8 = arith.constant 0 : index
      %13 = vector.load %arg5[%c0_7, %c0_8] : memref<128x128xbf16, #tpu.memory_space<vmem>>, vector<128x128xbf16>
      %cst = arith.constant dense<0.000000e+00> : vector<64x128xf32>
      %14 = tpu.matmul %12, %13, %cst {dimension_numbers = #tpu.dot_dimension_numbers<[1], [0], [0], [1], [0, 0, 1, 1], [], []>} : vector<64x128xbf16>, vector<128x128xbf16>, vector<64x128xf32> -> vector<64x128xf32>
      %15 = arith.addf %11, %14 : vector<64x128xf32>
      %c0_9 = arith.constant 0 : index
      %c0_10 = arith.constant 0 : index
      %16 = vector.load %arg12[%c0_9, %c0_10] : memref<64x128xf32, #tpu.memory_space<vmem>>, vector<64x128xf32>
      tpu.vector_store %arg12[%c0_9, %c0_10], %15 {strides = array<i32>} : memref<64x128xf32, #tpu.memory_space<vmem>>, vector<64x128xf32>,
    } else {
    }
    %c0_i32_2 = arith.constant 0 : i32
    %8 = arith.cmpi eq, %arg1, %c0_i32_2 : i32
    %9 = arith.extui %8 : i1 to i32
    %c0_i32_3 = arith.constant 0 : i32
    %10 = arith.cmpi ne, %9, %c0_i32_3 : i32
    scf.if %10 {
      %c0 = arith.constant 0 : index
      %c0_4 = arith.constant 0 : index
      %11 = vector.load %arg12[%c0, %c0_4] : memref<64x128xf32, #tpu.memory_space<vmem>>, vector<64x128xf32>
      %c0_5 = arith.constant 0 : index
      %c0_6 = arith.constant 0 : index
      %12 = vector.load %arg10[%c0_5, %c0_6] : memref<64x1xf32, #tpu.memory_space<vmem>>, vector<64x1xf32>
      %13 = vector.broadcast %12 : vector<64x1xf32> to vector<64x128xf32>
      %14 = arith.mulf %11, %13 : vector<64x128xf32>
      %c0_7 = arith.constant 0 : index
      %c0_8 = arith.constant 0 : index
      %15 = vector.load %arg6[%c0_7, %c0_8] : memref<64x128xbf16, #tpu.memory_space<vmem>>, vector<64x128xbf16>
      %c0_9 = arith.constant 0 : index
      %c0_10 = arith.constant 0 : index
      %16 = vector.load %arg7[%c0_9, %c0_10] : memref<128x128xbf16, #tpu.memory_space<vmem>>, vector<128x128xbf16>
      %cst = arith.constant dense<0.000000e+00> : vector<64x128xf32>
      %17 = tpu.matmul %15, %16, %cst {dimension_numbers = #tpu.dot_dimension_numbers<[1], [0], [0], [1], [0, 0, 1, 1], [], []>} : vector<64x128xbf16>, vector<128x128xbf16>, vector<64x128xf32> -> vector<64x128xf32>
      %18 = arith.truncf %14 : vector<64x128xf32> to vector<64x128xbf16>
      %c0_11 = arith.constant 0 : index
      %c0_12 = arith.constant 0 : index
      %19 = vector.load %arg8[%c0_11, %c0_12] : memref<128x128xbf16, #tpu.memory_space<vmem>>, vector<128x128xbf16>
      %cst_13 = arith.constant dense<0.000000e+00> : vector<64x128xf32>
      %20 = tpu.matmul %18, %19, %cst_13 {dimension_numbers = #tpu.dot_dimension_numbers<[1], [0], [0], [1], [0, 0, 1, 1], [], []>} : vector<64x128xbf16>, vector<128x128xbf16>, vector<64x128xf32> -> vector<64x128xf32>
      %21 = arith.addf %17, %20 : vector<64x128xf32>
      %c0_14 = arith.constant 0 : index
      %c0_15 = arith.constant 0 : index
      %22 = vector.load %arg9[%c0_14, %c0_15] : memref<1x128xf32, #tpu.memory_space<vmem>>, vector<1x128xf32>
      %23 = vector.broadcast %22 : vector<1x128xf32> to vector<64x128xf32>
      %24 = arith.addf %21, %23 : vector<64x128xf32>
      %cst_16 = arith.constant 0.000000e+00 : f32
      %25 = vector.broadcast %cst_16 : f32 to vector<64x128xf32>
      %26 = arith.maximumf %24, %25 : vector<64x128xf32>
      %27 = arith.truncf %26 : vector<64x128xf32> to vector<64x128xbf16>
      %c0_17 = arith.constant 0 : index
      %c0_18 = arith.constant 0 : index
      %28 = vector.load %arg11[%c0_17, %c0_18] : memref<64x128xbf16, #tpu.memory_space<vmem>>, vector<64x128xbf16>
      tpu.vector_store %arg11[%c0_17, %c0_18], %27 {strides = array<i32>} : memref<64x128xbf16, #tpu.memory_space<vmem>>, vector<64x128xbf16>,
    } else {
    }
    return
  }
  func.func @transform_0(%arg0: i32, %arg1: i32, %arg2: memref<2x1xi32, #tpu.memory_space<smem>>, %arg3: memref<2xi32, #tpu.memory_space<smem>>) -> (i32, i32) {
    %0 = arith.index_cast %arg0 : i32 to index
    %1 = arith.index_cast %arg1 : i32 to index
    %2 = memref.load %arg2[%0, %1] : memref<2x1xi32, #tpu.memory_space<smem>>
    %c0_i32 = arith.constant 0 : i32
    return %arg0, %2 : i32, i32
  }
  func.func @transform_1(%arg0: i32, %arg1: i32, %arg2: memref<2x1xi32, #tpu.memory_space<smem>>, %arg3: memref<2xi32, #tpu.memory_space<smem>>) -> (i32, i32) {
    %0 = arith.index_cast %arg0 : i32 to index
    %1 = arith.index_cast %arg1 : i32 to index
    %2 = memref.load %arg2[%0, %1] : memref<2x1xi32, #tpu.memory_space<smem>>
    %c0_i32 = arith.constant 0 : i32
    %c0_i32_0 = arith.constant 0 : i32
    return %2, %c0_i32 : i32, i32
  }
  func.func @transform_2(%arg0: i32, %arg1: i32, %arg2: memref<2x1xi32, #tpu.memory_space<smem>>, %arg3: memref<2xi32, #tpu.memory_space<smem>>) -> (i32, i32) {
    %c0_i32 = arith.constant 0 : i32
    %c0_i32_0 = arith.constant 0 : i32
    return %arg0, %c0_i32 : i32, i32
  }
  func.func @transform_3(%arg0: i32, %arg1: i32, %arg2: memref<2x1xi32, #tpu.memory_space<smem>>, %arg3: memref<2xi32, #tpu.memory_space<smem>>) -> (i32, i32) {
    %c0_i32 = arith.constant 0 : i32
    %c0_i32_0 = arith.constant 0 : i32
    %c0_i32_1 = arith.constant 0 : i32
    return %c0_i32, %c0_i32_0 : i32, i32
  }
  func.func @transform_4(%arg0: i32, %arg1: i32, %arg2: memref<2x1xi32, #tpu.memory_space<smem>>, %arg3: memref<2xi32, #tpu.memory_space<smem>>) -> (i32, i32) {
    %c0_i32 = arith.constant 0 : i32
    %c0_i32_0 = arith.constant 0 : i32
    %c0_i32_1 = arith.constant 0 : i32
    return %c0_i32, %c0_i32_0 : i32, i32
  }
  func.func @transform_5(%arg0: i32, %arg1: i32, %arg2: memref<2x1xi32, #tpu.memory_space<smem>>, %arg3: memref<2xi32, #tpu.memory_space<smem>>) -> (i32, i32) {
    %c0_i32 = arith.constant 0 : i32
    %c0_i32_0 = arith.constant 0 : i32
    %c0_i32_1 = arith.constant 0 : i32
    return %c0_i32, %c0_i32_0 : i32, i32
  }
  func.func @transform_6(%arg0: i32, %arg1: i32, %arg2: memref<2x1xi32, #tpu.memory_space<smem>>, %arg3: memref<2xi32, #tpu.memory_space<smem>>) -> (i32, i32) {
    %c0_i32 = arith.constant 0 : i32
    %c0_i32_0 = arith.constant 0 : i32
    return %arg0, %c0_i32 : i32, i32
  }
  func.func @transform_7(%arg0: i32, %arg1: i32, %arg2: memref<2x1xi32, #tpu.memory_space<smem>>, %arg3: memref<2xi32, #tpu.memory_space<smem>>) -> (i32, i32) {
    %c0_i32 = arith.constant 0 : i32
    %c0_i32_0 = arith.constant 0 : i32
    return %arg0, %c0_i32 : i32, i32
  }
}

</mosaic_0001>

<bundles_post_ra>
// kernel: tpu_custom_call.1
= control target key start
LH: loop header
LB: loop body
LE: loop exit
PB: predicated region body
PF: predicated region fallthrough
CT: control target
= control target key end

     0   :  { %s1753_s15 = smov [#allocation4]   ;;  %s1754_s16 = smov [#allocation5]   ;;  %s2032_s0 = inlined_call_operand.vmem [shape: s32[2,1], index: 0, kind: input, shape index: {}]   ;;  %s2033_s2 = inlined_call_operand.vmem [shape: bf16[128,128], index: 2, kind: input, shape index: {}]   ;;  %s2034_s3 = inlined_call_operand.vmem [shape: bf16[128,128], index: 3, kind: input, shape index: {}]   ;;  %s2035_s4 = inlined_call_operand.hbm [shape: bf16[128,128], index: 4, kind: input, shape index: {}]   ;;  %s2036_s5 = inlined_call_operand.hbm [shape: bf16[128,128], index: 5, kind: input, shape index: {}]   ;;  %s2037_s6 = inlined_call_operand.hbm [shape: bf16[128,128], index: 6, kind: input, shape index: {}]   ;;  %s2038_s7 = inlined_call_operand.vmem [shape: f32[1,128], index: 7, kind: input, shape index: {}]   ;;  %s2039_s8 = inlined_call_operand.vmem [shape: f32[128,1], index: 8, kind: input, shape index: {}]   ;;  %s2040_s9 = inlined_call_operand.hbm [shape: bf16[128,128], index: 9, kind: output, shape index: {}]   ;;  %s2041_s1 = inlined_call_operand.vmem [shape: s32[2], index: 1, kind: input, shape index: {}]  }
   0x1   :  { %2047 = sst [smem:[#allocation19_spill]] %s2035_s4  ;;  %s15_s11 = sshll.u32 %s2032_s0, 4  ;;  %s16_s11 = int_to_ptr.vmem [resolvable:$true] %s15_s11 }
   0x2   :  { %2048 = sst [smem:[#allocation20_spill]] %s2036_s5  ;;  %s20_s14 = sshll.u32 %s2041_s1, 4  ;;  %s21_s14 = int_to_ptr.vmem [resolvable:$true] %s20_s14 }
   0x3   :  { %2049 = sst [smem:[#allocation21_spill]] %s2037_s6 }
   0x4   :  { %2050 = sst [smem:[#allocation22_spill]] %s2039_s8 }
   0x5   :  { %18 = dma.vmem_to_smem %s16_s11, 32, %s1753_s15, [#allocation3] }
   0x6   :  { %23 = dma.vmem_to_smem %s21_s14, 16, %s1754_s16, [#allocation3] }
   0x7   :  { %1715 = dma.done.wait [#allocation3], 48 }
   0x8   :  { %1716 = vsyncadd [#allocation3], 4294967248 }
   0x9   :  { %26 = sfence }
   0xa   :  { %27 = vsyncpa [#allocation7], 0 }
   0xb   :  { %29 = vsyncpa [#allocation7 + $0x1], 0 }
   0xc   :  { %30 = vsyncpa [#allocation10], 0 }
   0xd   :  { %31 = vsyncpa [#allocation8], 0 }
   0xe   :  { %33 = vsyncpa [#allocation8 + $0x1], 0  ;;  %s1819_s17 = smov 0   ;;  %s1821_s0 = smov 0  }
   0xf   :  { %s1823_s18 = smov 0   ;;  %s1825_s1 = smov 0  }
  0x10   :  { %s1827_s19 = smov 0   ;;  %s1829_s20 = smov 0  }
  0x11 LB: > { %s1196_s21 = sadd.s32 4294967295, %s1751_s20   ;;  %s1197_s22 = sadd.s32 4294967294, %s1751_s20   ;;  %s1751_s20 = sphi %s1829_s20, %s39_s20   ;;  %s1747_s19 = sphi %s1827_s19, %s2071_s19   ;;  %s1743_s1 = sphi %s1825_s1, %s2070_s1   ;;  %s1739_s18 = sphi %s1823_s18, %s2069_s18   ;;  %s1735_s0 = sphi %s1821_s0, %s2068_s0   ;;  %s1731_s17 = sphi %s1819_s17, %s2067_s17  }
  0x12   : > { %p157_p0 = scmp.ne.s32.totalorder %s1735_s0, %s1731_s17  ;;  %p1855_p1 = scmp.eq.s32.totalorder %s1196_s21, 0 }
  0x13   : > { %p276_p2 = scmp.eq.s32.totalorder %s1197_s22, 1  ;;  %p1202_p4 = scmp.ge.s32.totalorder %s1751_s20, 1 }
  0x14   : > { %p1861_p3 = por %p1855_p1, %p157_p0  ;;  %p283_p6 = scmp.lt.s32.totalorder %s1751_s20, 3 }
  0x15   : > { %p1866_p5 = por %p276_p2, %p157_p0  ;;  %s2055_s5 = sld [smem:[#allocation20_spill]] }
  0x16   : > { %p1874_p7 = pnand %p1202_p4, %p283_p6  ;;  %s1755_s30 = smov [#allocation9]  }
  0x17   : > { %s2053_s25 = scalar_select %p1866_p5, 1, 0 }
  0x18   : > { %p1466_p8 = pneg %p1874_p7  ;;  %s296_s10 = sshll.u32 %s1755_s30, 4  ;;  %s297_s10 = int_to_ptr.vmem [resolvable:$true] %s296_s10 }
  0x19   : > { %2054 = sst [smem:[#allocation17_spill]] %s2053_s25  ;;  %p1205_p10 = scmp.ge.s32.totalorder %s1751_s20, 2 }
  0x1a   : > { %p1467_p9 = pnand %p1466_p8, %p1855_p1  ;;  %s2057_s6 = sld [smem:[#allocation21_spill]] }
  0x1b   : > { %s294_s28 = sshll.u32 %s2055_s5, 4  ;;  %s2042_s14 = smov 64   ;;  %s295_s28 = int_to_ptr.hbm [resolvable:$true] %s294_s28 }
  0x1c   : > { %s2043_s15 = smov 4   ;;  %s1758_s16 = smov [#allocation11]  }
  0x1d   : > { %1469 = dma.hbm_to_vmem [thread:$0]  (!%p1467_p9), %s295_s28, 1024, %s297_s10, [#allocation10], %s2042_s14, %s2042_s14, %s2043_s15  }
  0x1e   : > { %s310_s22 = sshll.u32 %s1758_s16, 4  ;;  %p270_p11 = scmp.eq.s32.totalorder %s1196_s21, 1  ;;  %s311_s22 = int_to_ptr.vmem [resolvable:$true] %s310_s22 }
  0x1f   : > { %s51_s26 = sadd.s32 1, %s1747_s19  ;;  %s144_s27 = sadd.s32 1, %s1739_s18 }
  0x20   : > { %s308_s13 = sshll.u32 %s2057_s6, 4  ;;  %p53_p12 = scmp.ge.s32.totalorder %s51_s26, 2  ;;  %s309_s13 = int_to_ptr.hbm [resolvable:$true] %s308_s13 }
  0x21   : > { %1472 = dma.hbm_to_vmem [thread:$0]  (!%p1467_p9), %s309_s13, 1024, %s311_s22, [#allocation10], %s2042_s14, %s2042_s14, %s2043_s15  }
  0x22   : > { %p151_p13 = scmp.ne.s32.totalorder %s1739_s18, %s1735_s0  ;;  %p152_p0 = scmp.eq.s32.totalorder %s1751_s20, 0 }
  0x23   : > { %s2073_s26 = smov (%p53_p12, %s51_s26), 0  ;;  %p1483_p4 = scmp.lt.s32.totalorder %s1751_s20, 2 }
  0x24   : > { %2058 = sst [smem:[#allocation18_spill]] %s2073_s26  ;;  %p1901_p2 = por %p270_p11, %p151_p13 }
  0x25   : > { %s141_s30 = ssub.s32 %s1747_s19, %s2073_s26  ;;  %s380_s10 = sand.u32 1, %s1739_s18  }
  0x26   : > { %p142_p6 = scmp.eq.s32.totalorder %s141_s30, 0  ;;  %p153_p8 = por %p152_p0, %p151_p13 }
  0x27   : > { %s1206_s11 = sshll.u32 %s380_s10, 5  ;;  %s1357_s21 = sshll.u32 %s1747_s19, 5 }
  0x28   : > { %s1911_s12 = scalar_select %p142_p6, %s1739_s18, %s144_s27  }
  0x29   : > { %s2060_s4 = sld [smem:[#allocation19_spill]]  ;;  %s384_s15 = scalar_lea.vmem [#allocation6], %s1206_s11 }
  0x2a   : > { %s392_s5 = sshll.u32 %s384_s15, 4  ;;  %p1474_p9 = pnand %p1483_p4, %p153_p8  ;;  %s393_s5 = int_to_ptr.vmem [resolvable:$true] %s392_s5 }
  0x2b   : > { %s381_s6 = scalar_lea.sflag [#allocation7], %s380_s10  ;;  %s2061_s26 = smov 4  }
  0x2c   : > { %s2062_s25 = smov 64   ;;  %s1924_s27 = sand.u32 (!%p1874_p7), 1, %s1735_s0  }
  0x2d   : > { %413 = sbr.rel (%p1874_p7) target bundleno = 548 (0x224), region = 48  ;;  %s2046_s15 = sshll.u32 (!%p1874_p7), %s1924_s27, 5 }
  0x2e   : > { %s416_s30 = scalar_lea.sflag (!%p1874_p7), [#allocation7], %s1924_s27  ;;  %s1930_s11 = scalar_lea.vmem (!%p1874_p7), [#allocation6], %s2046_s15 }
  0x2f   : > { %s389_s22 = scalar_lea.hbm %s2060_s4, %s1357_s21 }
  0x30   : > { %s390_s14 = sshll.u32 %s389_s22, 4  ;;  %s391_s14 = int_to_ptr.hbm [resolvable:$true] %s390_s14 }
  0x31   : > { %1476 = dma.hbm_to_vmem [thread:$0]  (!%p1474_p9), %s391_s14, 512, %s393_s5, %s381_s6, %s2062_s25, %s2062_s25, %s2061_s26  }
  0x32   : > { %1718 = dma.done.wait (%p1861_p3), %s416_s30, 512  }
  0x33   : > { %1720 = vsyncadd (%p1861_p3), %s416_s30, 4294966784 }
  0x34   : > { %1722 = dma.done.wait (%p1855_p1), [#allocation10], 2048  }
  0x35   : > { %1724 = vsyncadd (%p1855_p1), [#allocation10], 4294965248  ;;  %s1214_s5 = sshll.u32 %s1743_s1, 7  ;;  %s1215_s6 = sshll.u32 %s1743_s1, 3  ;;  %v1759_v0 = vmov 0.0  }
  0x36   : > { %s502_s25 = sld [smem:[#allocation4 + %s1214_s5]]  ;;  %p504_p7 = scmp.lt.s32.totalorder %s1215_s6, 15  ;;  %554 = vst [vmem:[#allocation2 + $0x30] sm:$0xff] %v1759_v0 }
  0x37   : > { %s527_s29 = sld [smem:[#allocation4 + %s1214_s5]]  ;;  %555 = vst [vmem:[#allocation2] sm:$0xff] %v1759_v0  ;;  %s2064_s26 = sshll.u32 %s1924_s27, 5 }
  0x38   : > { %s2075_s6 = smov (!%p504_p7, %s1215_s6), 15  ;;  %556 = vst [vmem:[#allocation2 + $0x18] sm:$0xff] %v1759_v0  ;;  %s562_s24 = sld [smem:[#allocation5 + %s1743_s1]] }
  0x39   : > { %557 = vst [vmem:[#allocation2 + $0x10] sm:$0xff] %v1759_v0  ;;  %s1221_s14 = sshll.u32 %s2075_s6, 3  ;;  %s2063_s8 = sld [smem:[#allocation22_spill]] }
  0x3a   : > { %558 = vst [vmem:[#allocation2 + $0x8] sm:$0xff] %v1759_v0 }
  0x3b   : > { %559 = vst [vmem:[#allocation2 + $0x20] sm:$0xff] %v1759_v0 }
  0x3c   : > { %p506_p1 = scmp.lt.s32.totalorder %s502_s25, 0  ;;  %560 = vst [vmem:[#allocation2 + $0x28] sm:$0xff] %v1759_v0 }
  0x3d   : > { %s1218_s21 = sshll.u32 %s527_s29, 4  ;;  %561 = vst [vmem:[#allocation2 + $0x38] sm:$0xff] %v1759_v0 }
  0x3e   : > { %s2077_s25 = smov (!%p506_p1, %s502_s25), 0  ;;  %p529_p3 = scmp.lt.s32.totalorder %s1218_s21, 15 }
  0x3f   : > { %s1946_s10 = scalar_lea.vmem %s2063_s8, %s1221_s14  ;;  %s508_s13 = sadd.s32 %s2077_s25, %s2075_s6 }
  0x40   : > { %s1216_s16 = sshll.u32 %s508_s13, 2  ;;  %s2079_s21 = smov (!%p529_p3, %s1218_s21), 15 }
  0x41   : > { %s1951_s5 = scalar_lea.vmem %s2033_s2, %s1216_s16  ;;  %s1219_s15 = sshll.u32 %s2079_s21, 2 }
  0x42   : > { %s1956_s14 = scalar_lea.vmem %s2034_s3, %s1219_s15  ;;  %s1960_s8 = scalar_lea.vmem [#allocation12], %s2064_s26 }
  0x43   : > { %p1223_p11 = scmp.le.s32.totalorder %s562_s24, 0 }
  0x45   : > { %566 = sbr.rel (%p1223_p11) target bundleno = 251 (0xfb), region = 68 }
  0x4a   : > { %v1369_v1 = vld [vmem:[%s1956_s14 + $0x38] sm:$0xff]  ;;  %v1368_v2 = vld [vmem:[%s1956_s14 + $0x30] sm:$0xff]  ;;  %v1367_v3 = vld [vmem:[%s1956_s14 + $0x28] sm:$0xff] }
  0x4b   : > { %671 = vmatpush.bf16.msra.mxu0 %v1369_v1  ;;  %1414 = vmatpush.bf16.msra.mxu1 %v1369_v1  ;;  %v1366_v4 = vld [vmem:[%s1956_s14 + $0x20] sm:$0xff]  ;;  %v1365_v5 = vld [vmem:[%s1956_s14 + $0x18] sm:$0xff]  ;;  %v1364_v6 = vld [vmem:[%s1956_s14 + $0x10] sm:$0xff] }
  0x4c   : > { %1415 = vmatpush.bf16.msra.mxu2 %v1369_v1  ;;  %1416 = vmatpush.bf16.msra.mxu3 %v1369_v1  ;;  %v1363_v7 = vld [vmem:[%s1956_s14 + $0x8] sm:$0xff]  ;;  %v1362_v8 = vld [vmem:[%s1956_s14] sm:$0xff]  ;;  %v1360_v11 = vld [vmem:[%s1951_s5 + $0x10] sm:$0xff] }
  0x4d   : > { %v1358_v9 = vld [vmem:[%s1951_s5] sm:$0xff]  ;;  %v1359_v10 = vld [vmem:[%s1951_s5 + $0x8] sm:$0xff]  ;;  %v1361_v12 = vld [vmem:[%s1951_s5 + $0x18] sm:$0xff] }
  0x4e   : > { %v567_v13 = vld [vmem:[#allocation2 + $0x30] sm:$0xff]  ;;  %v569_v14 = vld [vmem:[#allocation2 + $0x18] sm:$0xff]  ;;  %v571_v19 = vld [vmem:[#allocation2 + $0x8] sm:$0xff] }
  0x4f   : > { %672 = vmatpush.bf16.msra.mxu0 %v1368_v2  ;;  %1417 = vmatpush.bf16.msra.mxu1 %v1368_v2  ;;  %v573_v20 = vld [vmem:[#allocation2 + $0x28] sm:$0xff]  ;;  %v568_v21 = vld [vmem:[#allocation2] sm:$0xff]  ;;  %v570_v22 = vld [vmem:[#allocation2 + $0x10] sm:$0xff] }
  0x50   : > { %1418 = vmatpush.bf16.msra.mxu2 %v1368_v2  ;;  %1419 = vmatpush.bf16.msra.mxu3 %v1368_v2  ;;  %v572_v31 = vld [vmem:[#allocation2 + $0x20] sm:$0xff]  ;;  %v574_v32 = vld [vmem:[#allocation2 + $0x38] sm:$0xff] }
  0x53   : > { %673 = vmatpush.bf16.msra.mxu0 %v1367_v3  ;;  %1420 = vmatpush.bf16.msra.mxu1 %v1367_v3 }
  0x54   : > { %1421 = vmatpush.bf16.msra.mxu2 %v1367_v3  ;;  %1422 = vmatpush.bf16.msra.mxu3 %v1367_v3 }
  0x57   : > { %674 = vmatpush.bf16.msra.mxu0 %v1366_v4  ;;  %1423 = vmatpush.bf16.msra.mxu1 %v1366_v4 }
  0x58   : > { %1424 = vmatpush.bf16.msra.mxu2 %v1366_v4  ;;  %1425 = vmatpush.bf16.msra.mxu3 %v1366_v4 }
  0x5b   : > { %675 = vmatpush.bf16.msra.mxu0 %v1365_v5  ;;  %1426 = vmatpush.bf16.msra.mxu1 %v1365_v5 }
  0x5c   : > { %1427 = vmatpush.bf16.msra.mxu2 %v1365_v5  ;;  %1428 = vmatpush.bf16.msra.mxu3 %v1365_v5 }
  0x5f   : > { %676 = vmatpush.bf16.msra.mxu0 %v1364_v6  ;;  %1429 = vmatpush.bf16.msra.mxu1 %v1364_v6 }
  0x60   : > { %1430 = vmatpush.bf16.msra.mxu2 %v1364_v6  ;;  %1431 = vmatpush.bf16.msra.mxu3 %v1364_v6 }
  0x63   : > { %677 = vmatpush.bf16.msra.mxu0 %v1363_v7  ;;  %1432 = vmatpush.bf16.msra.mxu1 %v1363_v7 }
  0x64   : > { %1433 = vmatpush.bf16.msra.mxu2 %v1363_v7  ;;  %1434 = vmatpush.bf16.msra.mxu3 %v1363_v7 }
  0x67   : > { %678 = vmatpush.bf16.msra.mxu0 %v1362_v8  ;;  %1435 = vmatpush.bf16.msra.mxu1 %v1362_v8 }
  0x68   : > { %1436 = vmatpush.bf16.msra.mxu2 %v1362_v8  ;;  %1437 = vmatpush.bf16.msra.mxu3 %v1362_v8 }
  0x6a   : > { %679 = vmatmul.bf16.vlgmr.msra.gmra.mxu0 %v1358_v9  ;;  %684 = vmatmul.bf16.vlgmr.msra.gmra.mxu1 %v1359_v10 }
  0x6b   : > { %689 = vmatmul.bf16.vlgmr.msra.gmra.mxu2 %v1360_v11  ;;  %694 = vmatmul.bf16.vlgmr.msra.gmra.mxu3 %v1361_v12 }
  0xe7   : > { %v680_v15 = vpop.f32.mrf.mxu0  ;;  %v685_v16 = vpop.f32.mrf.mxu1 }
  0xe8   : > { %v700_v17 = vadd.f32 %v680_v15, %v567_v13  ;;  %v702_v18 = vadd.f32 %v685_v16, %v569_v14 }
  0xea   : > { %708 = vst [vmem:[#allocation2 + $0x30] sm:$0xff] %v700_v17 }
  0xeb   : > { %710 = vst [vmem:[#allocation2 + $0x18] sm:$0xff] %v702_v18 }
  0xee   : > { %v690_v23 = vpop.f32.mrf.mxu2  ;;  %v695_v24 = vpop.f32.mrf.mxu3 }
  0xef   : > { %v704_v25 = vadd.f32 %v690_v23, %v571_v19  ;;  %v706_v26 = vadd.f32 %v695_v24, %v573_v20  ;;  %v682_v27 = vpop.f32.mrf.mxu0  ;;  %v687_v28 = vpop.f32.mrf.mxu1 }
  0xf0   : > { %v701_v29 = vadd.f32 %v682_v27, %v568_v21  ;;  %v703_v30 = vadd.f32 %v687_v28, %v570_v22 }
  0xf1   : > { %712 = vst [vmem:[#allocation2 + $0x8] sm:$0xff] %v704_v25 }
  0xf2   : > { %714 = vst [vmem:[#allocation2 + $0x28] sm:$0xff] %v706_v26 }
  0xf3   : > { %709 = vst [vmem:[#allocation2] sm:$0xff] %v701_v29 }
  0xf4   : > { %711 = vst [vmem:[#allocation2 + $0x10] sm:$0xff] %v703_v30 }
  0xf6   : > { %v692_v33 = vpop.f32.mrf.mxu2  ;;  %v697_v34 = vpop.f32.mrf.mxu3 }
  0xf7   : > { %v705_v35 = vadd.f32 %v692_v33, %v572_v31  ;;  %v707_v36 = vadd.f32 %v697_v34, %v574_v32 }
  0xf9   : > { %713 = vst [vmem:[#allocation2 + $0x20] sm:$0xff] %v705_v35 }
  0xfa   : > { %715 = vst [vmem:[#allocation2 + $0x38] sm:$0xff] %v707_v36 }
  0xfb PF: > { %v731_v37 = vld [vmem:[%s1946_s10 + $0x20] sm:$0xff]  ;;  %v1760_v39 = vmov 0   ;;  %v733_v40 = vld [vmem:[%s1946_s10 + $0x30] sm:$0xff]  ;;  %v1381_v41 = vld [vmem:[#allocation9 + $0x38] sm:$0xff]  ;;  %s1054_s24 = sshll.u32 %s1960_s8, 4  ;;  %s1683_s30 = scalar_lea.hbm %s2040_s9, 64  ;;  %s1055_s24 = int_to_ptr.vmem [resolvable:$true] %s1054_s24 }
  0xfc   : > { %v727_v38 = vld [vmem:[%s1946_s10] sm:$0xff]  ;;  %1546 = vset.pattern.permute.xlu1 %v1760_v39  ;;  %1545 = vset.pattern.permute.xlu0 %v1760_v39  ;;  %v1389_v42 = vld [vmem:[#allocation11 + $0x38] sm:$0xff]  ;;  %v1380_v43 = vld [vmem:[#allocation9 + $0x30] sm:$0xff] }
  0xfd   : > { %757 = vperm.xlu0 %1545, %v731_v37   ;;  %737 = vperm.xlu1 %1546, %v727_v38   ;;  %v1388_v44 = vld [vmem:[#allocation11 + $0x30] sm:$0xff]  ;;  %v732_v45 = vld [vmem:[%s1946_s10 + $0x28] sm:$0xff]  ;;  %v734_v48 = vld [vmem:[%s1946_s10 + $0x38] sm:$0xff] }
  0xfe   : > { %1547 = vset.pattern.permute.xlu2 %v1760_v39  ;;  %1446 = vmatpush.bf16.msra.mxu3 %v1381_v41  ;;  %v728_v46 = vld [vmem:[%s1946_s10 + $0x8] sm:$0xff]  ;;  %v1378_v50 = vld [vmem:[#allocation9 + $0x20] sm:$0xff]  ;;  %v729_v52 = vld [vmem:[%s1946_s10 + $0x10] sm:$0xff] }
  0xff   : > { %767 = vperm.xlu2 %1547, %v733_v40   ;;  %976 = vmatpush.bf16.msra.mxu1 %v1381_v41  ;;  %v1379_v47 = vld [vmem:[#allocation9 + $0x28] sm:$0xff]  ;;  %v1386_v51 = vld [vmem:[#allocation11 + $0x20] sm:$0xff]  ;;  %v730_v53 = vld [vmem:[%s1946_s10 + $0x18] sm:$0xff] }
 0x100   : > { %875 = vmatpush.bf16.msra.mxu0 %v1389_v42  ;;  %1438 = vmatpush.bf16.msra.mxu2 %v1389_v42  ;;  %v1387_v49 = vld [vmem:[#allocation11 + $0x28] sm:$0xff]  ;;  %v1377_v54 = vld [vmem:[#allocation9 + $0x18] sm:$0xff]  ;;  %v1376_v56 = vld [vmem:[#allocation9 + $0x10] sm:$0xff] }
 0x101   : > { %v1385_v55 = vld [vmem:[#allocation11 + $0x18] sm:$0xff]  ;;  %v1375_v57 = vld [vmem:[#allocation9 + $0x8] sm:$0xff]  ;;  %v1384_v58 = vld [vmem:[#allocation11 + $0x10] sm:$0xff] }
 0x102   : > { %1447 = vmatpush.bf16.msra.mxu3 %v1380_v43  ;;  %v1374_v59 = vld [vmem:[#allocation9] sm:$0xff]  ;;  %v1372_v60 = vld [vmem:[%s1930_s11 + $0x10] sm:$0xff]  ;;  %v1383_v61 = vld [vmem:[#allocation11 + $0x8] sm:$0xff] }
 0x103   : > { %977 = vmatpush.bf16.msra.mxu1 %v1380_v43  ;;  %v1382_v62 = vld [vmem:[#allocation11] sm:$0xff]  ;;  %v1373_v0 = vld [vmem:[%s1930_s11 + $0x18] sm:$0xff]  ;;  %v1371_v1 = vld [vmem:[%s1930_s11 + $0x8] sm:$0xff] }
 0x104   : > { %876 = vmatpush.bf16.msra.mxu0 %v1388_v44  ;;  %1439 = vmatpush.bf16.msra.mxu2 %v1388_v44  ;;  %v1370_v63 = vld [vmem:[%s1930_s11] sm:$0xff]  ;;  %v723_v4 = vld [vmem:[#allocation2 + $0x8] sm:$0xff]  ;;  %v719_v5 = vld [vmem:[#allocation2 + $0x30] sm:$0xff]  ;;  %s1390_s11 = sshll.u32 %s1743_s1, 5  ;;  %s1042_s1 = scalar_lea.sflag [#allocation8], %s1924_s27 }
 0x105   : > { %762 = vperm.xlu0 %1545, %v732_v45   ;;  %742 = vperm.xlu1 %1546, %v728_v46   ;;  %v724_v6 = vld [vmem:[#allocation2 + $0x20] sm:$0xff]  ;;  %v725_v17 = vld [vmem:[#allocation2 + $0x28] sm:$0xff]  ;;  %v726_v19 = vld [vmem:[#allocation2 + $0x38] sm:$0xff]  ;;  %s1053_s29 = scalar_lea.hbm %s2040_s9, %s1390_s11 }
 0x106   : > { %1448 = vmatpush.bf16.msra.mxu3 %v1379_v47  ;;  %v720_v7 = vld [vmem:[#allocation2] sm:$0xff]  ;;  %v721_v21 = vld [vmem:[#allocation2 + $0x18] sm:$0xff]  ;;  %v722_v23 = vld [vmem:[#allocation2 + $0x10] sm:$0xff]  ;;  %s1056_s10 = sshll.u32 %s1053_s29, 4  ;;  %s1057_s10 = int_to_ptr.hbm [resolvable:$true] %s1056_s10 }
 0x107   : > { %772 = vperm.xlu2 %1547, %v734_v48   ;;  %978 = vmatpush.bf16.msra.mxu1 %v1379_v47  ;;  %v1548_v35 = vld [vmem:[%s2038_s7] ss:$0 sm:$0xff]  ;;  %s1677_s21 = sshra.s32 %s1057_s10, 4  ;;  %s1678_s21 = int_to_ptr.hbm [resolvable:$true] %s1677_s21 }
 0x108   : > { %877 = vmatpush.bf16.msra.mxu0 %v1387_v49  ;;  %1440 = vmatpush.bf16.msra.mxu2 %v1387_v49  ;;  %s1679_s13 = scalar_lea.hbm %s1678_s21, 32  ;;  %p1684_p4 = scmp.lt.s32.totalorder %s1678_s21, %s2040_s9 }
 0x109   : > { %p1680_p12 = scmp.ne.s32.totalorder %s1678_s21, %s1679_s13  ;;  %p1685_p6 = scmp.lt.s32.totalorder %s1683_s30, %s1679_s13 }
 0x10a   : > { %1449 = vmatpush.bf16.msra.mxu3 %v1378_v50 }
 0x10b   : > { %979 = vmatpush.bf16.msra.mxu1 %v1378_v50  ;;  %p1681_p13 = pnand %p1680_p12, %p1901_p2  ;;  %p1686_p8 = por %p1685_p6, %p1684_p4 }
 0x10c   : > { %878 = vmatpush.bf16.msra.mxu0 %v1386_v51  ;;  %1441 = vmatpush.bf16.msra.mxu2 %v1386_v51 }
 0x10d   : > { %747 = vperm.xlu0 %1545, %v729_v52   ;;  %752 = vperm.xlu1 %1546, %v730_v53   ;;  %p1682_p0 = pneg %p1681_p13 }
 0x10e   : > { %1450 = vmatpush.bf16.msra.mxu3 %v1377_v54 }
 0x10f   : > { %980 = vmatpush.bf16.msra.mxu1 %v1377_v54  ;;  %p1687_p9 = pnand %p1686_p8, %p1682_p0 }
 0x110   : > { %879 = vmatpush.bf16.msra.mxu0 %v1385_v55  ;;  %1442 = vmatpush.bf16.msra.mxu2 %v1385_v55 }
 0x112   : > { %1451 = vmatpush.bf16.msra.mxu3 %v1376_v56 }
 0x113   : > { %981 = vmatpush.bf16.msra.mxu1 %v1376_v56 }
 0x114   : > { %880 = vmatpush.bf16.msra.mxu0 %v1384_v58  ;;  %1443 = vmatpush.bf16.msra.mxu2 %v1384_v58 }
 0x116   : > { %1452 = vmatpush.bf16.msra.mxu3 %v1375_v57 }
 0x117   : > { %982 = vmatpush.bf16.msra.mxu1 %v1375_v57 }
 0x118   : > { %881 = vmatpush.bf16.msra.mxu0 %v1383_v61  ;;  %1444 = vmatpush.bf16.msra.mxu2 %v1383_v61 }
 0x11a   : > { %1453 = vmatpush.bf16.msra.mxu3 %v1374_v59 }
 0x11b   : > { %983 = vmatpush.bf16.msra.mxu1 %v1374_v59 }
 0x11c   : > { %882 = vmatpush.bf16.msra.mxu0 %v1382_v62  ;;  %1445 = vmatpush.bf16.msra.mxu2 %v1382_v62 }
 0x11d   : > { %994 = vmatmul.bf16.vlgmr.msra.gmra.mxu3 %v1372_v60 }
 0x11e   : > { %984 = vmatmul.bf16.vlgmr.msra.gmra.mxu1 %v1370_v63 }
 0x12d   : > { %999 = vmatmul.bf16.gmra.mxu3 %v1373_v0 }
 0x12e   : > { %989 = vmatmul.bf16.gmra.mxu1 %v1371_v1 }
 0x159   : > { %v768_v12 = vpop.permute.xlu2 %767 }
 0x15a   : > { %v781_v24 = vmul.f32 %v768_v12, %v725_v17 }
 0x161   : > { %v773_v18 = vpop.permute.xlu2 %772 }
 0x162   : > { %v782_v25 = vmul.f32 %v773_v18, %v726_v19 }
 0x164   : > { %v810_v29 = vpack.c.bf16 %v782_v25, %v781_v24 }
 0x16f   : > { %v758_v2 = vpop.permute.xlu0 %757  ;;  %v738_v3 = vpop.permute.xlu1 %737 }
 0x170   : > { %v779_v10 = vmul.f32 %v758_v2, %v723_v4  ;;  %v775_v11 = vmul.f32 %v738_v3, %v719_v5 }
 0x177   : > { %v763_v8 = vpop.permute.xlu0 %762  ;;  %v743_v9 = vpop.permute.xlu1 %742 }
 0x178   : > { %v780_v13 = vmul.f32 %v763_v8, %v724_v6  ;;  %v776_v14 = vmul.f32 %v743_v9, %v720_v7 }
 0x17a   : > { %v807_v15 = vpack.c.bf16 %v776_v14, %v775_v11  ;;  %v809_v16 = vpack.c.bf16 %v780_v13, %v779_v10 }
 0x17c   : > { %883 = vmatmul.bf16.vlgmr.msra.gmra.mxu0 %v807_v15  ;;  %893 = vmatmul.bf16.vlgmr.msra.gmra.mxu2 %v809_v16 }
 0x17f   : > { %v748_v20 = vpop.permute.xlu0 %747  ;;  %v753_v22 = vpop.permute.xlu1 %752 }
 0x180   : > { %v777_v26 = vmul.f32 %v748_v20, %v721_v21  ;;  %v778_v27 = vmul.f32 %v753_v22, %v722_v23 }
 0x182   : > { %v808_v28 = vpack.c.bf16 %v778_v27, %v777_v26 }
 0x18c   : > { %888 = vmatmul.bf16.gmra.mxu0 %v808_v28  ;;  %898 = vmatmul.bf16.gmra.mxu2 %v810_v29 }
 0x19b   : > { %v985_v30 = vpop.f32.mrf.mxu1 }
 0x1a0   : > { %v995_v31 = vpop.f32.mrf.mxu3 }
 0x1a3   : > { %v987_v33 = vpop.f32.mrf.mxu1 }
 0x1a8   : > { %v997_v40 = vpop.f32.mrf.mxu3 }
 0x1ab   : > { %v990_v46 = vpop.f32.mrf.mxu1 }
 0x1b0   : > { %v1000_v54 = vpop.f32.mrf.mxu3 }
 0x1b3   : > { %v992_v58 = vpop.f32.mrf.mxu1 }
 0x1b8   : > { %v1002_v2 = vpop.f32.mrf.mxu3 }
 0x1f9   : > { %v884_v32 = vpop.f32.mrf.mxu0 }
 0x1fa   : > { %v986_v34 = vadd.f32 %v985_v30, %v884_v32 }
 0x1fc   : > { %v1009_v38 = vadd.f32 %v1548_v35, %v986_v34 }
 0x1fe   : > { %v1017_v43 = vmax.f32 %v1009_v38, 0.0 }
 0x1ff   : > { %v894_v36 = vpop.f32.mrf.mxu2 }
 0x200   : > { %v996_v41 = vadd.f32 %v995_v31, %v894_v36 }
 0x201   : > { %v886_v37 = vpop.f32.mrf.mxu0 }
 0x202   : > { %v988_v39 = vadd.f32 %v987_v33, %v886_v37  ;;  %v1013_v47 = vadd.f32 %v1548_v35, %v996_v41 }
 0x204   : > { %v1010_v42 = vadd.f32 %v1548_v35, %v988_v39  ;;  %v1021_v52 = vmax.f32 %v1013_v47, 0.0 }
 0x206   : > { %v1018_v44 = vmax.f32 %v1010_v42, 0.0 }
 0x207   : > { %v896_v45 = vpop.f32.mrf.mxu2 }
 0x208   : > { %v1394_v48 = vpack.c.bf16 %v1018_v44, %v1017_v43  ;;  %v998_v49 = vadd.f32 %v997_v40, %v896_v45 }
 0x209   : > { %v889_v50 = vpop.f32.mrf.mxu0 }
 0x20a   : > { %1395 = vst [vmem:[%s1960_s8] sm:$0xff] %v1394_v48   ;;  %v1014_v51 = vadd.f32 %v1548_v35, %v998_v49  ;;  %v991_v56 = vadd.f32 %v990_v46, %v889_v50 }
 0x20c   : > { %v1022_v53 = vmax.f32 %v1014_v51, 0.0  ;;  %v1011_v60 = vadd.f32 %v1548_v35, %v991_v56 }
 0x20e   : > { %v1404_v55 = vpack.c.bf16 %v1022_v53, %v1021_v52  ;;  %v1019_v0 = vmax.f32 %v1011_v60, 0.0 }
 0x20f   : > { %v899_v57 = vpop.f32.mrf.mxu2 }
 0x210   : > { %1412 = vst [vmem:[%s1960_s8 + $0x10] sm:$0xff] %v1404_v55   ;;  %v1001_v62 = vadd.f32 %v1000_v54, %v899_v57 }
 0x211   : > { %v891_v59 = vpop.f32.mrf.mxu0 }
 0x212   : > { %v993_v61 = vadd.f32 %v992_v58, %v891_v59  ;;  %v1015_v4 = vadd.f32 %v1548_v35, %v1001_v62 }
 0x214   : > { %v1012_v63 = vadd.f32 %v1548_v35, %v993_v61  ;;  %v1023_v8 = vmax.f32 %v1015_v4, 0.0 }
 0x216   : > { %v1020_v1 = vmax.f32 %v1012_v63, 0.0 }
 0x217   : > { %v901_v3 = vpop.f32.mrf.mxu2 }
 0x218   : > { %v1399_v5 = vpack.c.bf16 %v1020_v1, %v1019_v0  ;;  %v1003_v6 = vadd.f32 %v1002_v2, %v901_v3 }
 0x21a   : > { %1411 = vst [vmem:[%s1960_s8 + $0x8] sm:$0xff] %v1399_v5   ;;  %v1016_v7 = vadd.f32 %v1548_v35, %v1003_v6 }
 0x21c   : > { %v1024_v9 = vmax.f32 %v1016_v7, 0.0 }
 0x21e   : > { %v1409_v10 = vpack.c.bf16 %v1024_v9, %v1023_v8 }
 0x220   : > { %1413 = vst [vmem:[%s1960_s8 + $0x18] sm:$0xff] %v1409_v10  }
 0x221   : > { %1690 = shalt.err (!%p1687_p9)
}
 0x222   : > { %s1761_s8 = smov 64   ;;  %s1762_s27 = smov 4  }
 0x223   : > { %1464 = dma.vmem_to_hbm [thread:$0]  (%p1901_p2), %s1055_s24, 512, %s1057_s10, %s1042_s1, %s1761_s8, %s1761_s8, %s1762_s27  }
 0x224 PF: > { %s1071_s26 = sand.u32 1, %s1731_s17   ;;  %p1478_p7 = pnand %p1205_p10, %p1866_p5 }
 0x225   : > { %s1072_s4 = scalar_lea.sflag [#allocation8], %s1071_s26 }
 0x226   : > { %p1479_p1 = pneg %p1478_p7 }
 0x228   : > { %1726 = dma.done.wait (%p1479_p1), %s1072_s4, 512  }
 0x229   : > { %1728 = vsyncadd (%p1479_p1), %s1072_s4, 4294966784  ;;  %s39_s20 = sadd.s32 1, %s1751_s20   ;;  %s2066_s28 = sld [smem:[#allocation18_spill]] }
 0x22a   : > { %p36_p3 = scmp.ge.s32.totalorder %s39_s20, 4   ;;  %s2067_s17 = smov %s1735_s0 }
 0x22b   : > { %s2068_s0 = smov %s1739_s18  ;;  %s2069_s18 = smov %s1911_s12 }
 0x22c   : > { %s2070_s1 = smov %s1747_s19  ;;  %38 = sbr.rel (!%p36_p3) target bundleno = 17 (0x11), region = 122 }
 0x22f   : > { %s2071_s19 = smov %s2066_s28 }
 0x231   :  { %1078 = vsyncpa [#allocation7], 1 }
 0x232   :  { %1080 = vsyncpa [#allocation7 + $0x1], 1 }
 0x233   :  { %1081 = vsyncpa [#allocation10], 1 }
 0x234   :  { %1082 = vsyncpa [#allocation8], 1 }
 0x235   :  { %1084 = vsyncpa [#allocation8 + $0x1], 1 }

</bundles_post_ra>
